<compile_context>
chip_gen: v7x
topology: tpu7x:2x2x1
jax: 0.10.0
libtpu: 0.0.40
codegen_flags: <defaults>
</compile_context>

<pallas_src>
import functools

import jax
import jax.numpy as jnp
import numpy as np
from jax.experimental import pallas as pl
from jax.experimental.pallas import tpu as pltpu


def _group_kernel(xnd_ref, xt_ref, nbh_ref, ctr_ref, *, G, M):
    # xnd_ref: (N, D) points; xt_ref: (D, N) transposed points.
    N, D = xnd_ref.shape
    INF = jnp.float32(1e30)

    x_nd = xnd_ref[...].astype(jnp.float32)                       # (N, D)
    x_t = xt_ref[...].astype(jnp.float32)                         # (D, N)
    xsq = jnp.sum(x_t * x_t, axis=0, keepdims=True)               # (1, N) lane-dense

    lane_ids = jax.lax.broadcasted_iota(jnp.int32, (1, N), 1)     # (1, N)

    # ---------------- farthest point sampling (serial, lane-dense) ----------
    # Carry is only (scalar index, (1, N) min-distance); centroids are written
    # directly into the center output ref.
    def fps_body(i, carry):
        far, min_d = carry
        c_row = xnd_ref[pl.ds(far, 1), :].astype(jnp.float32)     # (1, D)
        ctr_ref[pl.ds(i, 1), :] = c_row.astype(ctr_ref.dtype)
        csq = jnp.sum(c_row * c_row)                              # scalar
        cross = jnp.dot(c_row, x_t,
                        preferred_element_type=jnp.float32)       # (1, N)
        d = xsq - 2.0 * cross + csq                               # (1, N)
        min_d = jnp.minimum(min_d, d)
        max_v = jnp.max(min_d)
        far_new = jnp.min(
            jnp.where(min_d >= max_v, lane_ids, N)).astype(jnp.int32)
        return far_new, min_d

    jax.lax.fori_loop(
        0, G, fps_body,
        (jnp.int32(0), jnp.full((1, N), INF, dtype=jnp.float32)))

    centers = ctr_ref[...].astype(jnp.float32)                    # (G, D)

    # ---------------- KNN: k = M nearest points of each center --------------
    csq = jnp.sum(centers * centers, axis=-1, keepdims=True)      # (G, 1)
    cross = jnp.dot(centers, x_t,
                    preferred_element_type=jnp.float32)           # (G, N)
    dist = csq - 2.0 * cross + xsq                                # (G, N)

    col_ids = jax.lax.broadcasted_iota(jnp.int32, (G, N), 1)      # (G, N)
    kcol_ids = jax.lax.broadcasted_iota(jnp.int32, (G, M), 1)     # (G, M)

    def knn_body(j, carry):
        dcur, idx = carry
        row_min = jnp.min(dcur, axis=-1, keepdims=True)           # (G, 1)
        sel = jnp.min(jnp.where(dcur <= row_min, col_ids, N), axis=-1,
                      keepdims=True).astype(jnp.int32)            # (G, 1)
        idx = jnp.where(kcol_ids == j, sel, idx)                  # (G, M)
        dcur = jnp.where(col_ids == sel, INF, dcur)               # (G, N)
        return dcur, idx

    # M is a small static constant -> unroll so iterations overlap.
    _, idx = jax.lax.fori_loop(
        0, M, knn_body,
        (dist, jnp.zeros((G, M), dtype=jnp.int32)),
        unroll=True)

    # ------------- gather neighbors (chunked one-hot matmul) & recenter -----
    CHUNK = 8   # kept small so (CHUNK*G, N) one-hot stays well under VMEM on v7x
    parts = []
    for m0 in range(0, M, CHUNK):
        ms = list(range(m0, min(m0 + CHUNK, M)))
        cols = [(col_ids == idx[:, m:m + 1]).astype(jnp.float32) for m in ms]
        onehot = cols[0] if len(cols) == 1 else jnp.concatenate(cols, axis=0)
        gathered = jnp.dot(onehot, x_nd,
                           preferred_element_type=jnp.float32)    # (C*G, D)
        for k in range(len(ms)):
            parts.append(gathered[k * G:(k + 1) * G, :] - centers)
    nbh = jnp.concatenate(parts, axis=-1)                         # (G, M*D)
    nbh_ref[...] = nbh.astype(nbh_ref.dtype)


def group_forward(xyz, num_group, group_size):
    """neighborhood: (B, G, M, 24) centered at each group; center: (B, G, 24)."""
    B, N, D = xyz.shape
    assert D == 24, "Group module assumes 24-dim points"
    G, M = num_group, group_size
    xyz_t = jnp.transpose(xyz, (0, 2, 1))   # (B, D, N) layout plumbing in XLA
    kernel = functools.partial(_group_kernel, G=G, M=M)
    nbh_flat, center = pl.pallas_call(
        kernel,
        out_shape=(jax.ShapeDtypeStruct((B, G, M * D), xyz.dtype),
                   jax.ShapeDtypeStruct((B, G, D), xyz.dtype)),
        grid_spec=pltpu.PrefetchScalarGridSpec(
            num_scalar_prefetch=0,
            grid=(B,),
            in_specs=[pl.BlockSpec((None, N, D), lambda b: (b, 0, 0)),
                      pl.BlockSpec((None, D, N), lambda b: (b, 0, 0))],
            out_specs=[pl.BlockSpec((None, G, M * D), lambda b: (b, 0, 0)),
                       pl.BlockSpec((None, G, D), lambda b: (b, 0, 0))],
        ),
        compiler_params=pltpu.CompilerParams(
            dimension_semantics=("parallel",)),
    )(xyz, xyz_t)
    neighborhood = nbh_flat.reshape(B, G, M, D)
    return neighborhood, center


def group_reference(xyz, G, M):
    """Pure-JAX reference (same semantics as the PyTorch module)."""
    B, N, D = xyz.shape

    def fps_one(x):
        def body(i, carry):
            far, mind, centers = carry
            centroid = x[far]
            centers = centers.at[i].set(centroid)
            d = jnp.sum((x - centroid[None, :]) ** 2, axis=-1)
            mind = jnp.minimum(mind, d)
            far = jnp.argmax(mind).astype(jnp.int32)
            return far, mind, centers

        carry0 = (jnp.int32(0), jnp.full((N,), 1e30, jnp.float32),
                  jnp.zeros((G, D), jnp.float32))
        return jax.lax.fori_loop(0, G, body, carry0)[2]

    centers = jax.vmap(fps_one)(xyz)                                   # (B, G, D)
    dist = (jnp.sum(centers ** 2, -1, keepdims=True)
            - 2.0 * jnp.einsum('bgd,bnd->bgn', centers, xyz)
            + jnp.sum(xyz ** 2, -1)[:, None, :])                       # (B, G, N)
    _, idx = jax.lax.top_k(-dist, M)                                   # (B, G, M)
    gathered = jax.vmap(lambda pts, ids: pts[ids])(xyz, idx)           # (B, G, M, D)
    return gathered - centers[:, :, None, :], centers


if __name__ == "__main__":
    key = jax.random.PRNGKey(0)
    B, N, D = 2, 64, 24
    num_group, group_size = 8, 4

    xyz = jax.random.normal(key, (B, N, D), dtype=jnp.float32)

    nbh, ctr = group_forward(xyz, num_group, group_size)
    jax.block_until_ready((nbh, ctr))

    nbh_ref, ctr_ref = group_reference(xyz, num_group, group_size)

    assert nbh.shape == (B, num_group, group_size, D)
    assert ctr.shape == (B, num_group, D)
    assert np.allclose(np.asarray(ctr), np.asarray(ctr_ref), atol=1e-4)
    assert np.allclose(np.asarray(nbh), np.asarray(nbh_ref), atol=1e-4)

    print("KERNEL_OK")
</pallas_src>

<mosaic_0001>
module attributes {stable_mosaic.version = 11 : i64} {
  func.func @_group_kernel(%arg0: i32, %arg1: memref<1x64x24xf32, #tpu.memory_space<vmem>>, %arg2: memref<1x24x64xf32, #tpu.memory_space<vmem>>, %arg3: memref<1x8x96xf32, #tpu.memory_space<vmem>>, %arg4: memref<1x8x24xf32, #tpu.memory_space<vmem>>) attributes {dimension_semantics = [#tpu.dimension_semantics<parallel>], iteration_bounds = array<i64: 2>, scalar_prefetch = 0 : i64, scratch_operands = 0 : i64, tpu.core_type = #tpu.core_type<tc>, window_params = [{transform_indices = @transform_0, window_bounds = array<i64: 1, 64, 24>}, {transform_indices = @transform_1, window_bounds = array<i64: 1, 24, 64>}, {transform_indices = @transform_2, window_bounds = array<i64: 1, 8, 96>}, {transform_indices = @transform_3, window_bounds = array<i64: 1, 8, 24>}]} {
    %c0 = arith.constant 0 : index
    %c0_0 = arith.constant 0 : index
    %c0_1 = arith.constant 0 : index
    %0 = vector.load %arg1[%c0, %c0_0, %c0_1] : memref<1x64x24xf32, #tpu.memory_space<vmem>>, vector<1x64x24xf32>
    %1 = vector.shape_cast %0 : vector<1x64x24xf32> to vector<64x24xf32>
    %c0_2 = arith.constant 0 : index
    %c0_3 = arith.constant 0 : index
    %c0_4 = arith.constant 0 : index
    %2 = vector.load %arg2[%c0_2, %c0_3, %c0_4] : memref<1x24x64xf32, #tpu.memory_space<vmem>>, vector<1x24x64xf32>
    %3 = vector.shape_cast %2 : vector<1x24x64xf32> to vector<24x64xf32>
    %4 = arith.mulf %3, %3 : vector<24x64xf32>
    %cst = arith.constant dense<0.000000e+00> : vector<64xf32>
    %5 = vector.multi_reduction <add>, %4, %cst [0] : vector<24x64xf32> to vector<64xf32>
    %6 = vector.shape_cast %5 : vector<64xf32> to vector<1x64xf32>
    %7 = tpu.iota {dimensions = array<i32: 1>} : vector<1x64xi32>
    %cst_5 = arith.constant 1.000000e+30 : f32
    %8 = vector.broadcast %cst_5 : f32 to vector<1x64xf32>
    %c0_i32 = arith.constant 0 : i32
    %c0_i32_6 = arith.constant 0 : i32
    %c8_i32 = arith.constant 8 : i32
    %9 = arith.addi %c0_i32_6, %c8_i32 : i32
    %c1_i32 = arith.constant 1 : i32
    %10:2 = scf.for %arg5 = %c0_i32_6 to %9 step %c1_i32 iter_args(%arg6 = %c0_i32, %arg7 = %8) -> (i32, vector<1x64xf32>)  : i32 {
      %c0_33 = arith.constant 0 : index
      %128 = arith.index_cast %arg6 : i32 to index
      %c0_34 = arith.constant 0 : index
      %129 = vector.load %arg1[%c0_33, %128, %c0_34] : memref<1x64x24xf32, #tpu.memory_space<vmem>>, vector<1x1x24xf32>
      %130 = vector.shape_cast %129 : vector<1x1x24xf32> to vector<1x24xf32>
      %c0_35 = arith.constant 0 : index
      %131 = arith.index_cast %arg5 : i32 to index
      %c0_36 = arith.constant 0 : index
      %132 = vector.load %arg4[%c0_35, %131, %c0_36] : memref<1x8x24xf32, #tpu.memory_space<vmem>>, vector<1x1x24xf32>
      %133 = vector.shape_cast %132 : vector<1x1x24xf32> to vector<1x24xf32>
      %134 = vector.shape_cast %130 : vector<1x24xf32> to vector<1x1x24xf32>
      tpu.vector_store %arg4[%c0_35, %131, %c0_36], %134 {strides = array<i32>} : memref<1x8x24xf32, #tpu.memory_space<vmem>>, vector<1x1x24xf32>,
      %135 = arith.mulf %130, %130 : vector<1x24xf32>
      %136 = vector.shape_cast %135 : vector<1x24xf32> to vector<1x1x24xf32>
      %cst_37 = arith.constant dense<0.000000e+00> : vector<1xf32>
      %137 = vector.multi_reduction <add>, %136, %cst_37 [1, 2] : vector<1x1x24xf32> to vector<1xf32>
      %138 = vector.shape_cast %137 : vector<1xf32> to vector<1x1x1xf32>
      %139 = vector.extract %138[0, 0, 0] : f32 from vector<1x1x1xf32>
      %cst_38 = arith.constant dense<0.000000e+00> : vector<1x64xf32>
      %140 = tpu.matmul %130, %3, %cst_38 {dimension_numbers = #tpu.dot_dimension_numbers<[1], [0], [0], [1], [0, 0, 1, 1], [], []>} : vector<1x24xf32>, vector<24x64xf32>, vector<1x64xf32> -> vector<1x64xf32>
      %cst_39 = arith.constant 2.000000e+00 : f32
      %141 = vector.broadcast %cst_39 : f32 to vector<1x64xf32>
      %142 = arith.mulf %141, %140 : vector<1x64xf32>
      %143 = arith.subf %6, %142 : vector<1x64xf32>
      %144 = vector.broadcast %139 : f32 to vector<1x64xf32>
      %145 = arith.addf %143, %144 : vector<1x64xf32>
      %146 = arith.minimumf %arg7, %145 : vector<1x64xf32>
      %147 = vector.shape_cast %146 : vector<1x64xf32> to vector<1x1x64xf32>
      %cst_40 = arith.constant dense<0xFF800000> : vector<1xf32>
      %148 = vector.multi_reduction <maximumf>, %147, %cst_40 [1, 2] : vector<1x1x64xf32> to vector<1xf32>
      %149 = vector.shape_cast %148 : vector<1xf32> to vector<1x1x1xf32>
      %150 = vector.extract %149[0, 0, 0] : f32 from vector<1x1x1xf32>
      %151 = vector.broadcast %150 : f32 to vector<1x64xf32>
      %152 = arith.cmpf oge, %146, %151 : vector<1x64xf32>
      %c64_i32_41 = arith.constant 64 : i32
      %153 = vector.broadcast %c64_i32_41 : i32 to vector<1x64xi32>
      %154 = arith.select %152, %7, %153 : vector<1x64xi1>, vector<1x64xi32>
      %155 = vector.shape_cast %154 : vector<1x64xi32> to vector<1x1x64xi32>
      %cst_42 = arith.constant dense<2147483647> : vector<1xi32>
      %156 = vector.multi_reduction <minsi>, %155, %cst_42 [1, 2] : vector<1x1x64xi32> to vector<1xi32>
      %157 = vector.shape_cast %156 : vector<1xi32> to vector<1x1x1xi32>
      %158 = vector.extract %157[0, 0, 0] : i32 from vector<1x1x1xi32>
      scf.yield %158, %146 : i32, vector<1x64xf32>
    }
    %c8_i32_7 = arith.constant 8 : i32
    %c0_8 = arith.constant 0 : index
    %c0_9 = arith.constant 0 : index
    %c0_10 = arith.constant 0 : index
    %11 = vector.load %arg4[%c0_8, %c0_9, %c0_10] : memref<1x8x24xf32, #tpu.memory_space<vmem>>, vector<1x8x24xf32>
    %12 = vector.shape_cast %11 : vector<1x8x24xf32> to vector<8x24xf32>
    %13 = arith.mulf %12, %12 : vector<8x24xf32>
    %cst_11 = arith.constant dense<0.000000e+00> : vector<8xf32>
    %14 = vector.multi_reduction <add>, %13, %cst_11 [1] : vector<8x24xf32> to vector<8xf32>
    %15 = vector.shape_cast %14 : vector<8xf32> to vector<8x1xf32>
    %cst_12 = arith.constant dense<0.000000e+00> : vector<8x64xf32>
    %16 = tpu.matmul %12, %3, %cst_12 {dimension_numbers = #tpu.dot_dimension_numbers<[1], [0], [0], [1], [0, 0, 1, 1], [], []>} : vector<8x24xf32>, vector<24x64xf32>, vector<8x64xf32> -> vector<8x64xf32>
    %cst_13 = arith.constant 2.000000e+00 : f32
    %17 = vector.broadcast %cst_13 : f32 to vector<8x64xf32>
    %18 = arith.mulf %17, %16 : vector<8x64xf32>
    %19 = vector.broadcast %15 : vector<8x1xf32> to vector<8x64xf32>
    %20 = arith.subf %19, %18 : vector<8x64xf32>
    %21 = vector.broadcast %6 : vector<1x64xf32> to vector<8x64xf32>
    %22 = arith.addf %20, %21 : vector<8x64xf32>
    %23 = tpu.iota {dimensions = array<i32: 1>} : vector<8x64xi32>
    %24 = tpu.iota {dimensions = array<i32: 1>} : vector<8x4xi32>
    %c0_i32_14 = arith.constant 0 : i32
    %25 = vector.broadcast %c0_i32_14 : i32 to vector<8x4xi32>
    %cst_15 = arith.constant 1.000000e+30 : f32
    %c0_i32_16 = arith.constant 0 : i32
    %cst_17 = arith.constant dense<0x7F800000> : vector<8xf32>
    %26 = vector.multi_reduction <minimumf>, %22, %cst_17 [1] : vector<8x64xf32> to vector<8xf32>
    %27 = vector.shape_cast %26 : vector<8xf32> to vector<8x1xf32>
    %28 = vector.broadcast %27 : vector<8x1xf32> to vector<8x64xf32>
    %29 = arith.cmpf ole, %22, %28 : vector<8x64xf32>
    %c64_i32 = arith.constant 64 : i32
    %30 = vector.broadcast %c64_i32 : i32 to vector<8x64xi32>
    %31 = arith.select %29, %23, %30 : vector<8x64xi1>, vector<8x64xi32>
    %cst_18 = arith.constant dense<2147483647> : vector<8xi32>
    %32 = vector.multi_reduction <minsi>, %31, %cst_18 [1] : vector<8x64xi32> to vector<8xi32>
    %33 = vector.shape_cast %32 : vector<8xi32> to vector<8x1xi32>
    %34 = vector.broadcast %c0_i32_16 : i32 to vector<8x4xi32>
    %35 = arith.cmpi eq, %24, %34 : vector<8x4xi32>
    %36 = vector.shape_cast %33 : vector<8x1xi32> to vector<8x1xi32>
    %37 = vector.broadcast %36 : vector<8x1xi32> to vector<8x4xi32>
    %38 = arith.select %35, %37, %25 : vector<8x4xi1>, vector<8x4xi32>
    %39 = vector.broadcast %33 : vector<8x1xi32> to vector<8x64xi32>
    %40 = arith.cmpi eq, %23, %39 : vector<8x64xi32>
    %41 = vector.broadcast %cst_15 : f32 to vector<8x64xf32>
    %42 = arith.select %40, %41, %22 : vector<8x64xi1>, vector<8x64xf32>
    %c1_i32_19 = arith.constant 1 : i32
    %cst_20 = arith.constant dense<0x7F800000> : vector<8xf32>
    %43 = vector.multi_reduction <minimumf>, %42, %cst_20 [1] : vector<8x64xf32> to vector<8xf32>
    %44 = vector.shape_cast %43 : vector<8xf32> to vector<8x1xf32>
    %45 = vector.broadcast %44 : vector<8x1xf32> to vector<8x64xf32>
    %46 = arith.cmpf ole, %42, %45 : vector<8x64xf32>
    %c64_i32_21 = arith.constant 64 : i32
    %47 = vector.broadcast %c64_i32_21 : i32 to vector<8x64xi32>
    %48 = arith.select %46, %23, %47 : vector<8x64xi1>, vector<8x64xi32>
    %cst_22 = arith.constant dense<2147483647> : vector<8xi32>
    %49 = vector.multi_reduction <minsi>, %48, %cst_22 [1] : vector<8x64xi32> to vector<8xi32>
    %50 = vector.shape_cast %49 : vector<8xi32> to vector<8x1xi32>
    %51 = vector.broadcast %c1_i32_19 : i32 to vector<8x4xi32>
    %52 = arith.cmpi eq, %24, %51 : vector<8x4xi32>
    %53 = vector.shape_cast %50 : vector<8x1xi32> to vector<8x1xi32>
    %54 = vector.broadcast %53 : vector<8x1xi32> to vector<8x4xi32>
    %55 = arith.select %52, %54, %38 : vector<8x4xi1>, vector<8x4xi32>
    %56 = vector.broadcast %50 : vector<8x1xi32> to vector<8x64xi32>
    %57 = arith.cmpi eq, %23, %56 : vector<8x64xi32>
    %58 = vector.broadcast %cst_15 : f32 to vector<8x64xf32>
    %59 = arith.select %57, %58, %42 : vector<8x64xi1>, vector<8x64xf32>
    %c2_i32 = arith.constant 2 : i32
    %cst_23 = arith.constant dense<0x7F800000> : vector<8xf32>
    %60 = vector.multi_reduction <minimumf>, %59, %cst_23 [1] : vector<8x64xf32> to vector<8xf32>
    %61 = vector.shape_cast %60 : vector<8xf32> to vector<8x1xf32>
    %62 = vector.broadcast %61 : vector<8x1xf32> to vector<8x64xf32>
    %63 = arith.cmpf ole, %59, %62 : vector<8x64xf32>
    %c64_i32_24 = arith.constant 64 : i32
    %64 = vector.broadcast %c64_i32_24 : i32 to vector<8x64xi32>
    %65 = arith.select %63, %23, %64 : vector<8x64xi1>, vector<8x64xi32>
    %cst_25 = arith.constant dense<2147483647> : vector<8xi32>
    %66 = vector.multi_reduction <minsi>, %65, %cst_25 [1] : vector<8x64xi32> to vector<8xi32>
    %67 = vector.shape_cast %66 : vector<8xi32> to vector<8x1xi32>
    %68 = vector.broadcast %c2_i32 : i32 to vector<8x4xi32>
    %69 = arith.cmpi eq, %24, %68 : vector<8x4xi32>
    %70 = vector.shape_cast %67 : vector<8x1xi32> to vector<8x1xi32>
    %71 = vector.broadcast %70 : vector<8x1xi32> to vector<8x4xi32>
    %72 = arith.select %69, %71, %55 : vector<8x4xi1>, vector<8x4xi32>
    %73 = vector.broadcast %67 : vector<8x1xi32> to vector<8x64xi32>
    %74 = arith.cmpi eq, %23, %73 : vector<8x64xi32>
    %75 = vector.broadcast %cst_15 : f32 to vector<8x64xf32>
    %76 = arith.select %74, %75, %59 : vector<8x64xi1>, vector<8x64xf32>
    %c3_i32 = arith.constant 3 : i32
    %cst_26 = arith.constant dense<0x7F800000> : vector<8xf32>
    %77 = vector.multi_reduction <minimumf>, %76, %cst_26 [1] : vector<8x64xf32> to vector<8xf32>
    %78 = vector.shape_cast %77 : vector<8xf32> to vector<8x1xf32>
    %79 = vector.broadcast %78 : vector<8x1xf32> to vector<8x64xf32>
    %80 = arith.cmpf ole, %76, %79 : vector<8x64xf32>
    %c64_i32_27 = arith.constant 64 : i32
    %81 = vector.broadcast %c64_i32_27 : i32 to vector<8x64xi32>
    %82 = arith.select %80, %23, %81 : vector<8x64xi1>, vector<8x64xi32>
    %cst_28 = arith.constant dense<2147483647> : vector<8xi32>
    %83 = vector.multi_reduction <minsi>, %82, %cst_28 [1] : vector<8x64xi32> to vector<8xi32>
    %84 = vector.shape_cast %83 : vector<8xi32> to vector<8x1xi32>
    %85 = vector.broadcast %c3_i32 : i32 to vector<8x4xi32>
    %86 = arith.cmpi eq, %24, %85 : vector<8x4xi32>
    %87 = vector.shape_cast %84 : vector<8x1xi32> to vector<8x1xi32>
    %88 = vector.broadcast %87 : vector<8x1xi32> to vector<8x4xi32>
    %89 = arith.select %86, %88, %72 : vector<8x4xi1>, vector<8x4xi32>
    %90 = vector.broadcast %84 : vector<8x1xi32> to vector<8x64xi32>
    %91 = arith.cmpi eq, %23, %90 : vector<8x64xi32>
    %92 = vector.broadcast %cst_15 : f32 to vector<8x64xf32>
    %93 = arith.select %91, %92, %76 : vector<8x64xi1>, vector<8x64xf32>
    %c4_i32 = arith.constant 4 : i32
    %94 = vector.extract_strided_slice %89 {offsets = [0, 0], sizes = [8, 1], strides = [1, 1]} : vector<8x4xi32> to vector<8x1xi32>
    %95 = vector.broadcast %94 : vector<8x1xi32> to vector<8x64xi32>
    %96 = arith.cmpi eq, %23, %95 : vector<8x64xi32>
    %97 = arith.extui %96 : vector<8x64xi1> to vector<8x64xi32>
    %98 = arith.sitofp %97 : vector<8x64xi32> to vector<8x64xf32>
    %99 = vector.extract_strided_slice %89 {offsets = [0, 1], sizes = [8, 1], strides = [1, 1]} : vector<8x4xi32> to vector<8x1xi32>
    %100 = vector.broadcast %99 : vector<8x1xi32> to vector<8x64xi32>
    %101 = arith.cmpi eq, %23, %100 : vector<8x64xi32>
    %102 = arith.extui %101 : vector<8x64xi1> to vector<8x64xi32>
    %103 = arith.sitofp %102 : vector<8x64xi32> to vector<8x64xf32>
    %104 = vector.extract_strided_slice %89 {offsets = [0, 2], sizes = [8, 1], strides = [1, 1]} : vector<8x4xi32> to vector<8x1xi32>
    %105 = vector.broadcast %104 : vector<8x1xi32> to vector<8x64xi32>
    %106 = arith.cmpi eq, %23, %105 : vector<8x64xi32>
    %107 = arith.extui %106 : vector<8x64xi1> to vector<8x64xi32>
    %108 = arith.sitofp %107 : vector<8x64xi32> to vector<8x64xf32>
    %109 = vector.extract_strided_slice %89 {offsets = [0, 3], sizes = [8, 1], strides = [1, 1]} : vector<8x4xi32> to vector<8x1xi32>
    %110 = vector.broadcast %109 : vector<8x1xi32> to vector<8x64xi32>
    %111 = arith.cmpi eq, %23, %110 : vector<8x64xi32>
    %112 = arith.extui %111 : vector<8x64xi1> to vector<8x64xi32>
    %113 = arith.sitofp %112 : vector<8x64xi32> to vector<8x64xf32>
    %114 = tpu.concatenate %98, %103, %108, %113 in 0 : vector<8x64xf32>, vector<8x64xf32>, vector<8x64xf32>, vector<8x64xf32> -> vector<32x64xf32>
    %cst_29 = arith.constant dense<0.000000e+00> : vector<32x24xf32>
    %115 = tpu.matmul %114, %1, %cst_29 {dimension_numbers = #tpu.dot_dimension_numbers<[1], [0], [0], [1], [0, 0, 1, 1], [], []>} : vector<32x64xf32>, vector<64x24xf32>, vector<32x24xf32> -> vector<32x24xf32>
    %116 = vector.extract_strided_slice %115 {offsets = [0, 0], sizes = [8, 24], strides = [1, 1]} : vector<32x24xf32> to vector<8x24xf32>
    %117 = arith.subf %116, %12 : vector<8x24xf32>
    %118 = vector.extract_strided_slice %115 {offsets = [8, 0], sizes = [8, 24], strides = [1, 1]} : vector<32x24xf32> to vector<8x24xf32>
    %119 = arith.subf %118, %12 : vector<8x24xf32>
    %120 = vector.extract_strided_slice %115 {offsets = [16, 0], sizes = [8, 24], strides = [1, 1]} : vector<32x24xf32> to vector<8x24xf32>
    %121 = arith.subf %120, %12 : vector<8x24xf32>
    %122 = vector.extract_strided_slice %115 {offsets = [24, 0], sizes = [8, 24], strides = [1, 1]} : vector<32x24xf32> to vector<8x24xf32>
    %123 = arith.subf %122, %12 : vector<8x24xf32>
    %124 = tpu.concatenate %117, %119, %121, %123 in 1 : vector<8x24xf32>, vector<8x24xf32>, vector<8x24xf32>, vector<8x24xf32> -> vector<8x96xf32>
    %c0_30 = arith.constant 0 : index
    %c0_31 = arith.constant 0 : index
    %c0_32 = arith.constant 0 : index
    %125 = vector.load %arg3[%c0_30, %c0_31, %c0_32] : memref<1x8x96xf32, #tpu.memory_space<vmem>>, vector<1x8x96xf32>
    %126 = vector.shape_cast %125 : vector<1x8x96xf32> to vector<8x96xf32>
    %127 = vector.shape_cast %124 : vector<8x96xf32> to vector<1x8x96xf32>
    tpu.vector_store %arg3[%c0_30, %c0_31, %c0_32], %127 {strides = array<i32>} : memref<1x8x96xf32, #tpu.memory_space<vmem>>, vector<1x8x96xf32>,
    return
  }
  func.func @transform_0(%arg0: i32) -> (i32, i32, i32) {
    %c0_i32 = arith.constant 0 : i32
    %c0_i32_0 = arith.constant 0 : i32
    %c0_i32_1 = arith.constant 0 : i32
    return %arg0, %c0_i32, %c0_i32_0 : i32, i32, i32
  }
  func.func @transform_1(%arg0: i32) -> (i32, i32, i32) {
    %c0_i32 = arith.constant 0 : i32
    %c0_i32_0 = arith.constant 0 : i32
    %c0_i32_1 = arith.constant 0 : i32
    return %arg0, %c0_i32, %c0_i32_0 : i32, i32, i32
  }
  func.func @transform_2(%arg0: i32) -> (i32, i32, i32) {
    %c0_i32 = arith.constant 0 : i32
    %c0_i32_0 = arith.constant 0 : i32
    %c0_i32_1 = arith.constant 0 : i32
    return %arg0, %c0_i32, %c0_i32_0 : i32, i32, i32
  }
  func.func @transform_3(%arg0: i32) -> (i32, i32, i32) {
    %c0_i32 = arith.constant 0 : i32
    %c0_i32_0 = arith.constant 0 : i32
    %c0_i32_1 = arith.constant 0 : i32
    return %arg0, %c0_i32, %c0_i32_0 : i32, i32, i32
  }
}

</mosaic_0001>

<bundles_post_ra>
// kernel: tpu_custom_call.1
= control target key start
LH: loop header
LB: loop body
LE: loop exit
PB: predicated region body
PF: predicated region fallthrough
CT: control target
= control target key end

     0   :  { %9 = vsyncpa [#allocation3], 0  ;;  %s1473_s0 = inlined_call_operand.vmem [shape: f32[2,64,24], index: 0, kind: input, shape index: {}]   ;;  %s1474_s1 = inlined_call_operand.vmem [shape: f32[2,24,64], index: 1, kind: input, shape index: {}]   ;;  %s1475_s2 = inlined_call_operand.hbm [shape: f32[2,8,96], index: 2, kind: output, shape index: {0}]   ;;  %s1476_s3 = inlined_call_operand.hbm [shape: f32[2,8,24], index: 3, kind: output, shape index: {1}]  }
   0x1   :  { %11 = vsyncpa [#allocation3 + $0x1], 0 }
   0x2   :  { %12 = vsyncpa [#allocation5], 0 }
   0x3   :  { %14 = vsyncpa [#allocation5 + $0x1], 0  ;;  %s1194_s12 = smov 0   ;;  %s1196_s13 = smov 0  }
   0x4   :  { %s1198_s14 = smov 0   ;;  %s1200_s15 = smov 0  }
   0x5 LB: > { %s1215_s16 = sadd.s32 4294967295, %s1145_s15   ;;  %s838_s17 = sadd.s32 4294967294, %s1145_s15   ;;  %s1145_s15 = sphi %s1200_s15, %s1482_s15   ;;  %s1141_s14 = sphi %s1198_s14, %s1481_s14   ;;  %s1137_s13 = sphi %s1196_s13, %s1480_s13   ;;  %s1133_s12 = sphi %s1194_s12, %s1479_s12  }
   0x6   : > { %s1219_s18 = sadd.s32 1, %s1145_s15   ;;  %s79_s19 = sadd.s32 1, %s1141_s14 }
   0x7   : > { %s76_s20 = ssub.s32 %s1145_s15, %s1219_s18  ;;  %p89_p0 = scmp.ne.s32.totalorder %s1141_s14, %s1137_s13 }
   0x8   : > { %p77_p1 = scmp.eq.s32.totalorder %s76_s20, 0  ;;  %p90_p2 = scmp.eq.s32.totalorder %s1215_s16, 1 }
   0x9   : > { %p95_p3 = scmp.ne.s32.totalorder %s1137_s13, %s1133_s12  ;;  %p96_p4 = scmp.eq.s32.totalorder %s838_s17, 1 }
   0xa   : > { %s1230_s21 = scalar_select %p77_p1, %s1141_s14, %s79_s19  }
   0xb   : > { %p1232_p5 = por %p90_p2, %p89_p0  ;;  %p1236_p6 = por %p96_p4, %p95_p3 }
   0xc   : > { %p841_p7 = scmp.ge.s32.totalorder %s1145_s15, 1  ;;  %p156_p8 = scmp.lt.s32.totalorder %s1145_s15, 3 }
   0xe   : > { %p157_p9 = pnand %p841_p7, %p156_p8 }
   0xf   : > { %s1243_s24 = sand.u32 (!%p157_p9), 1, %s1137_s13   ;;  %p190_p10 = scmp.lt.s32.totalorder (!%p157_p9), %s1215_s16, 1  ;;  %v226_v0 = vlaneseq (!%p157_p9)  ;;  %vm214_vm0 = vcmask (!%p157_p9), 523264   ;;  %v1307_v27 = vmov (!%p157_p9), 1e+30  }
  0x10   : > { %160 = sbr.rel (%p157_p9) target bundleno = 2892 (0xb4c), region = 28  ;;  %s842_s25 = sshll.u32 (!%p157_p9), %s1243_s24, 3 }
  0x11   : > { %v1247_v1 = vand.u32 (!%p157_p9), 127, %v226_v0  ;;  %s1301_s8 = scalar_lea.vmem (!%p157_p9), [#allocation2], %s842_s25  ;;  %s1305_s9 = scalar_lea.vmem (!%p157_p9), [#allocation4], %s842_s25 }
  0x12   : > { %s1309_s10 = smov (!%p157_p9), 0   ;;  %s1311_s11 = smov (!%p157_p9), 0  }
  0x17   : > { %s191_s26 = scalar_select %p190_p10, %s1215_s16, 1 }
  0x19   : > { %s863_s27 = sshll.u32 %s191_s26, 6  ;;  %s946_s28 = smul.u32 24, %s191_s26 }
  0x1a   : > { %s1253_s4 = scalar_lea.vmem %s1473_s0, %s863_s27 }
  0x1b   : > { %s199_s7 = scalar_lea.vmem %s1474_s1, %s946_s28  ;;  %v1259_v2 = vld [vmem:[%s1253_s4] sm:$0xff]  ;;  %v1262_v3 = vld [vmem:[%s1253_s4 + $0x8] sm:$0xff]  ;;  %v1265_v4 = vld [vmem:[%s1253_s4 + $0x10] sm:$0xff] }
  0x1c   : > { %v1268_v5 = vld [vmem:[%s1253_s4 + $0x18] sm:$0xff]  ;;  %v1271_v6 = vld [vmem:[%s1253_s4 + $0x20] sm:$0xff]  ;;  %v1274_v7 = vld [vmem:[%s1253_s4 + $0x28] sm:$0xff] }
  0x1d   : > { %v1277_v8 = vld [vmem:[%s1253_s4 + $0x30] sm:$0xff]  ;;  %v1280_v9 = vld [vmem:[%s1253_s4 + $0x38] sm:$0xff]  ;;  %v1282_v10 = vld [vmem:[%s199_s7] sm:$0xff] }
  0x1e   : > { %v1284_v11 = vld [vmem:[%s199_s7 + $0x8] sm:$0xff]  ;;  %v1286_v12 = vld [vmem:[%s199_s7 + $0x10] sm:$0xff]  ;;  %v211_v13 = vmul.f32 %v1282_v10, %v1282_v10 }
  0x1f   : > { %v212_v14 = vmul.f32 %v1284_v11, %v1284_v11  ;;  %v213_v15 = vmul.f32 %v1286_v12, %v1286_v12 }
  0x20   : > { %v215_v16 = vsel %vm214_vm0, %v211_v13, 0.0 }
  0x21   : > { %v216_v17 = vsel %vm214_vm0, %v212_v14, 0.0  ;;  %v218_v18 = vsel %vm214_vm0, %v213_v15, 0.0 }
  0x22   : > { %v217_v19 = vadd.f32 %v216_v17, %v215_v16 }
  0x24   : > { %v219_v20 = vadd.f32 %v218_v18, %v217_v19 }
  0x26   : > { %v220_v21 = vrot.slane %v219_v20, 4 }
  0x28   : > { %v221_v22 = vadd.f32 %v220_v21, %v219_v20 }
  0x2a   : > { %v222_v23 = vrot.slane %v221_v22, 2 }
  0x2c   : > { %v223_v24 = vadd.f32 %v222_v23, %v221_v22 }
  0x2e   : > { %v224_v25 = vrot.slane %v223_v24, 1 }
  0x30   : > { %v1297_v26 = vadd.f32 %v224_v25, %v223_v24 }
  0x31 LB: >> { %v1320_v28 = vpack.c.bf16 %v1284_v11, %v1282_v10  ;;  %v1159_v29 = vmov 0.0|0.0   ;;  %vm1160_vm1 = vmmov 0   ;;  %v1161_v30 = vmov 0.0   ;;  %s236_s17 = scalar_lea.vmem %s1253_s4, %s1153_s10  ;;  %s238_s19 = scalar_lea.vmem %s1305_s9, %s1157_s11 [#allocation4]  ;;  %s1157_s11 = sphi %s1311_s11, %s233_s11   ;;  %s1153_s10 = sphi %s1309_s10, %s952_s10   ;;  %v1149_v27 = vphi %v1307_v27, %v330_v27  }
  0x32   : >> { %924 = vmatprep.subr.bf16.mxu0 %v1159_v29  ;;  %890 = vmatprep.mubr.msk.f32.mxu0 %vm1160_vm1, %v1161_v30  ;;  %v237_v31 = vld [vmem:[%s236_s17] sm:$0x1]  ;;  %vm239_vm2 = vcmask 188416   ;;  %vm252_vm3 = vcmask 195584   ;;  %vm331_vm4 = vcmask 516096   ;;  %s233_s11 = sadd.s32 1, %s1157_s11  }
  0x33   : >> { %926 = vmatpush3.bf16.msra.mxu0 %v1320_v28  ;;  %v241_v32 = vmul.f32 %v237_v31, %v237_v31  ;;  %240 = vst.msk [vmem:[%s238_s19] sm:$0x1] %vm239_vm2, %v237_v31  ;;  %p230_p11 = scmp.ge.s32.totalorder %s233_s11, 8  }
  0x34   : >> { %888 = vmatprep.subr.mxu0 %v1161_v30  ;;  %v1162_v24 = vmov (%p230_p11), 0.0|0.0   ;;  %vm1163_vm10 = vmmov (%p230_p11), 0   ;;  %v1164_v25 = vmov (%p230_p11), 0.0   ;;  %vm472_vm1 = vcmp.eq.s32.totalorder (%p230_p11), %v1247_v1, 0  ;;  %s1169_s26 = smov (%p230_p11), 24   ;;  %s859_s27 = sshll.u32 (%p230_p11), %s1215_s16, 7 }
  0x35   : >> { %v242_v33 = vsel %vm239_vm2, %v241_v32, 0.0  ;;  %vm496_vm2 = vcmp.eq.s32.totalorder (%p230_p11), %v1247_v1, 1  ;;  %s722_s28 = sshll.u32 (%p230_p11), %s1305_s9, 4  ;;  %s1399_s4 = scalar_lea.hbm (%p230_p11), %s1476_s3, %s859_s27  ;;  %s723_s28 = int_to_ptr.vmem [resolvable:$true] %s722_s28 }
  0x36   : >> { %243 = vadd.xlane.f32.xlu0 %v242_v33  ;;  %s696_s5 = scalar_lea.sflag (%p230_p11), [#allocation5], %s1243_s24  ;;  %s1039_s6 = scalar_lea.vmem (%p230_p11), %s723_s28, 128 }
  0x37   : >> { %889 = vmatpush3.msra.mxu0 %v1286_v12  ;;  %p1040_p12 = scmp.ne.s32.totalorder (%p230_p11), %s723_s28, %s1039_s6  ;;  %s1170_s7 = smov (%p230_p11), [#allocation4]  }
  0x38   : >> { %891 = vmatmul.mubr.msk.f32.vlgmr.msra.gmra.mrb[0].mxu0 %vm252_vm3, %v237_v31  ;;  %927 = vmatprep.subr.bf16.mxu0 (%p230_p11), %v1162_v24 }
  0x39   : > { %899 = vmatprep.mubr.msk.f32.mxu0 (%p230_p11), %vm1163_vm10, %v1164_v25  ;;  %929 = vmatpush3.bf16.msra.mxu0 (%p230_p11), %v1320_v28  ;;  %p1041_p13 = pnand (%p230_p11), %p1040_p12, %p1232_p5 }
  0x3a   : > { %v1340_v23 = vld [vmem:[%s1305_s9] sm:$0xff] (%p230_p11)  ;;  %897 = vmatprep.subr.mxu0 (%p230_p11), %v1164_v25 }
  0x3b   : > { %v371_v29 = vmul.f32 (%p230_p11), %v1340_v23, %v1340_v23  ;;  %p1042_p0 = pneg (%p230_p11), %p1041_p13 }
  0x3d   : > { %898 = vmatpush3.msra.mxu0 (%p230_p11), %v1286_v12 }
  0xc3   : >> { %v244_v34 = vpop.xlane.xlu0 %243 }
  0xc4   : >> { %v245_v35 = vrot.slane %v244_v34, 4 }
  0xc6   : >> { %v246_v36 = vadd.f32 %v245_v35, %v244_v34 }
  0xc8   : >> { %v247_v37 = vrot.slane %v246_v36, 2 }
  0xca   : >> { %v248_v38 = vadd.f32 %v247_v37, %v246_v36 }
  0xcc   : >> { %v249_v39 = vrot.slane %v248_v38, 1 }
  0xce   : >> { %v250_v40 = vadd.f32 %v249_v39, %v248_v38 }
  0xd0   : >> { %947 = vpush %v250_v40 }
 0x101   : >> { %s948_s20 = spop %947 }
 0x102   : >> { %v328_v45 = vstv %s948_s20 }
 0x10b   : >> { %v322_v41 = vpop.f32.mrb[0].mxu0 }
 0x10c   : >> { %v326_v42 = vmul.f32 2.0, %v322_v41  ;;  %v892_v43 = vpop.f32.mrb[1].mxu0  ;;  %900 = vmatmul.mubr.msk.f32.vlgmr.msra.gmra.mrb[0].mxu0 (%p230_p11), %vm252_vm3, %v1340_v23 }
 0x10e   : >> { %v327_v44 = vsub.f32 %v1297_v26, %v326_v42 }
 0x110   : >> { %v329_v46 = vadd.f32 %v328_v45, %v327_v44 }
 0x112   : >> { %v330_v27 = vmin.f32 %v1149_v27, %v329_v46  }
 0x114   : >> { %v332_v47 = vsel %vm331_vm4, %v330_v27, -inf }
 0x115   : >> { %333 = vmax.xlane.f32.xlu0 %v332_v47 }
 0x1a2   : >> { %v334_v48 = vpop.xlane.xlu0 %333 }
 0x1a3   : >> { %v335_v49 = vrot.slane %v334_v48, 4 }
 0x1a5   : >> { %v336_v50 = vmax.f32 %v334_v48, %v335_v49 }
 0x1a7   : >> { %v337_v51 = vrot.slane %v336_v50, 2 }
 0x1a9   : >> { %v338_v52 = vmax.f32 %v336_v50, %v337_v51 }
 0x1ab   : >> { %v339_v53 = vrot.slane %v338_v52, 1 }
 0x1ad   : >> { %v340_v54 = vmax.f32 %v338_v52, %v339_v53 }
 0x1af   : >> { %949 = vpush %v340_v54 }
 0x1df   : > { %v445_v10 = vpop.f32.mrb[0].mxu0 (%p230_p11) }
 0x1e0   : >> { %s950_s25 = spop %949  ;;  %v449_v30 = vmul.f32 (%p230_p11), 2.0, %v445_v10  ;;  %v901_v31 = vpop.f32.mrb[1].mxu0 (%p230_p11) }
 0x1e1   : >> { %v342_v55 = vstv %s950_s25 }
 0x1e2   : >> { %vm343_vm5 = vcmp.ge.f32.partialorder %v330_v27, %v342_v55  ;;  %v373_v27 = vsel (%p230_p11), %vm252_vm3, %v371_v29, 0.0 }
 0x1e3   : >> { %v344_v56 = vsel %vm343_vm5, %v1247_v1, 64  ;;  %374 = vadd.xlane.f32.xlu0 (%p230_p11), %v373_v27 }
 0x1e4   : >> { %v345_v57 = vsel %vm331_vm4, %v344_v56, 2147483647 }
 0x1e5   : >> { %v347_v58 = vshra.s32 %v345_v57, 16  ;;  %v346_v60 = vand.u32 65535, %v345_v57 }
 0x1e7   : >> { %v349_v59 = vcvt.s32.f32 %v347_v58  ;;  %v348_v62 = vcvt.s32.f32 %v346_v60 }
 0x1e9   : >> { %350 = vmin.xlane.f32.xlu1 %v349_v59 }
 0x270   : > { %v375_v11 = vpop.xlane.xlu0 (%p230_p11), %374 }
 0x271   : > { %v450_v32 = vsub.f32 (%p230_p11), %v375_v11, %v449_v30 }
 0x273   : > { %v451_v33 = vadd.f32 (%p230_p11), %v450_v32, %v1297_v26 }
 0x275   : > { %v452_v34 = vsel (%p230_p11), %vm214_vm0, %v451_v33, inf }
 0x276   : >> { %v351_v61 = vpop.xlane.xlu1 %350  ;;  %453 = vmin.xlane.f32.xlu0 (%p230_p11), %v452_v34 }
 0x277   : >> { %vm352_vm6 = vcmp.eq.f32.partialorder %v349_v59, %v351_v61  ;;  %v357_v0 = vcvt.f32.s32 %v351_v61 }
 0x278   : >> { %v353_v63 = vsel %vm352_vm6, %v348_v62, inf }
 0x279   : >> { %354 = vmin.xlane.f32.xlu1 %v353_v63  ;;  %v358_v14 = vshll.u32 %v357_v0, 16 }
 0x303   : > { %v454_v28 = vpop.xlane.xlu0 (%p230_p11), %453 }
 0x304   : > { %vm455_vm11 = vcmp.le.f32.partialorder (%p230_p11), %v451_v33, %v454_v28 }
 0x305   : > { %v456_v35 = vsel (%p230_p11), %vm455_vm11, %v1247_v1, 64  ;;  %vm544_vm11 = vcmp.eq.s32.totalorder (%p230_p11), %v1247_v1, 3 }
 0x306   : >> { %v355_v13 = vpop.xlane.xlu1 %354  ;;  %v457_v36 = vsel (%p230_p11), %vm214_vm0, %v456_v35, 2147483647 }
 0x307   : >> { %v356_v15 = vcvt.f32.s32 %v355_v13  ;;  %v459_v12 = vshra.s32 (%p230_p11), %v457_v36, 16  ;;  %v458_v38 = vand.u32 (%p230_p11), 65535, %v457_v36 }
 0x309   : >> { %v359_v16 = vadd.s32 %v358_v14, %v356_v15  ;;  %v461_v37 = vcvt.s32.f32 (%p230_p11), %v459_v12  ;;  %v460_v40 = vcvt.s32.f32 (%p230_p11), %v458_v38 }
 0x30b   : >> { %v360_v17 = vrot.slane %v359_v16, 4  ;;  %462 = vmin.xlane.f32.xlu1 (%p230_p11), %v461_v37 }
 0x30d   : >> { %vm361_vm7 = vcmp.lt.s32.totalorder %v359_v16, %v360_v17 }
 0x30e   : >> { %v362_v18 = vsel %vm361_vm7, %v359_v16, %v360_v17  ;;  %vm520_vm7 = vcmp.eq.s32.totalorder (%p230_p11), %v1247_v1, 2 }
 0x30f   : >> { %v363_v19 = vrot.slane %v362_v18, 2 }
 0x311   : >> { %vm364_vm8 = vcmp.lt.s32.totalorder %v362_v18, %v363_v19 }
 0x312   : >> { %v365_v20 = vsel %vm364_vm8, %v362_v18, %v363_v19 }
 0x313   : >> { %v366_v21 = vrot.slane %v365_v20, 1 }
 0x315   : >> { %vm367_vm9 = vcmp.lt.s32.totalorder %v365_v20, %v366_v21 }
 0x316   : >> { %v368_v22 = vsel %vm367_vm9, %v365_v20, %v366_v21 }
 0x317   : >> { %951 = vpush %v368_v22 }
 0x342   : > { %232 = sbr.rel (!%p230_p11) target bundleno = 49 (0x31), region = 92 }
 0x348   : >> { %s952_s10 = spop %951  }
 0x349   : > { %s1043_s10 = sshll.u32 %s1170_s7, 4  ;;  %s1044_s10 = int_to_ptr.vmem [resolvable:$false] %s1043_s10 }
 0x34a   : > { %s1045_s11 = scalar_lea.vmem %s1044_s10, 256  ;;  %p1046_p1 = scmp.lt.s32.totalorder %s723_s28, %s1044_s10 }
 0x34b   : > { %p1047_p2 = scmp.lt.s32.totalorder %s1045_s11, %s1039_s6 }
 0x34d   : > { %p1048_p3 = por %p1047_p2, %p1046_p1 }
 0x34f   : > { %p1049_p4 = pnand %p1048_p3, %p1042_p0 }
 0x398   : > { %v463_v39 = vpop.xlane.xlu1 %462 }
 0x399   : > { %vm464_vm12 = vcmp.eq.f32.partialorder %v461_v37, %v463_v39  ;;  %v469_v42 = vcvt.f32.s32 %v463_v39 }
 0x39a   : > { %v465_v41 = vsel %vm464_vm12, %v460_v40, inf  ;;  %v1165_v40 = vmov 1  }
 0x39b   : > { %466 = vmin.xlane.f32.xlu1 %v465_v41  ;;  %v470_v43 = vshll.u32 %v469_v42, 16  ;;  %1035 = vset.pattern.permute.xlu0 %v1165_v40  ;;  %v1166_v41 = vmov 0   ;;  %v930_v42 = vpack.c.bf16 %v1262_v3, %v1259_v2 }
 0x39c   : > { %1034 = vset.pattern.permute.xlu1 %v1166_v41 }
 0x39d   : > { %931 = vmatprep.subr.bf16.mxu1 %v930_v42 }
 0x39e   : > { %933 = vmatpush3.bf16.msra.mxu1 %v930_v42 }
 0x428   : > { %v467_v26 = vpop.xlane.xlu1 %466 }
 0x429   : > { %v468_v44 = vcvt.f32.s32 %v467_v26  ;;  %v934_v26 = vpack.c.bf16 %v1268_v5, %v1265_v4 }
 0x42b   : > { %v471_v45 = vadd.s32 %v470_v43, %v468_v44  ;;  %935 = vmatprep.subr.bf16.mxu1 %v934_v26  ;;  %v938_v43 = vpack.c.bf16 %v1274_v7, %v1271_v6  ;;  %v942_v44 = vpack.c.bf16 %v1280_v9, %v1277_v8  ;;  %v1168_v6 = vmov 3  }
 0x42c   : > { %937 = vmatpush3.bf16.msra.mxu1 %v934_v26 }
 0x42d   : > { %vm474_vm13 = vcmp.eq.s32.totalorder %v1247_v1, %v471_v45  ;;  %v473_v62 = vsel %vm472_vm1, %v471_v45, 0  ;;  %939 = vmatprep.subr.bf16.mxu1 %v938_v43 }
 0x42e   : > { %v475_v46 = vsel %vm474_vm13, 1e+30, %v451_v33 }
 0x42f   : > { %v476_v47 = vsel %vm214_vm0, %v475_v46, inf }
 0x430   : > { %477 = vmin.xlane.f32.xlu0 %v476_v47  ;;  %941 = vmatpush3.bf16.msra.mxu1 %v938_v43  ;;  %v1167_v47 = vmov 2  }
 0x431   : > { %943 = vmatprep.subr.bf16.mxu1 %v942_v44 }
 0x434   : > { %945 = vmatpush3.bf16.msra.mxu1 %v942_v44 }
 0x4bd   : > { %v478_v48 = vpop.xlane.xlu0 %477 }
 0x4be   : > { %vm479_vm14 = vcmp.le.f32.partialorder %v475_v46, %v478_v48 }
 0x4bf   : > { %v480_v49 = vsel %vm479_vm14, %v1247_v1, 64 }
 0x4c0   : > { %v481_v50 = vsel %vm214_vm0, %v480_v49, 2147483647 }
 0x4c1   : > { %v483_v51 = vshra.s32 %v481_v50, 16  ;;  %v482_v53 = vand.u32 65535, %v481_v50 }
 0x4c3   : > { %v485_v52 = vcvt.s32.f32 %v483_v51  ;;  %v484_v55 = vcvt.s32.f32 %v482_v53 }
 0x4c5   : > { %486 = vmin.xlane.f32.xlu1 %v485_v52 }
 0x552   : > { %v487_v54 = vpop.xlane.xlu1 %486 }
 0x553   : > { %vm488_vm15 = vcmp.eq.f32.partialorder %v485_v52, %v487_v54  ;;  %v493_v57 = vcvt.f32.s32 %v487_v54 }
 0x554   : > { %v489_v56 = vsel %vm488_vm15, %v484_v55, inf }
 0x555   : > { %490 = vmin.xlane.f32.xlu0 %v489_v56  ;;  %v494_v59 = vshll.u32 %v493_v57, 16 }
 0x5e2   : > { %v491_v58 = vpop.xlane.xlu0 %490 }
 0x5e3   : > { %v492_v60 = vcvt.f32.s32 %v491_v58 }
 0x5e5   : > { %v495_v61 = vadd.s32 %v494_v59, %v492_v60 }
 0x5e7   : > { %v497_v63 = vsel %vm496_vm2, %v495_v61, %v473_v62  ;;  %vm498_vm4 = vcmp.eq.s32.totalorder %v1247_v1, %v495_v61 }
 0x5e8   : > { %v499_v0 = vsel %vm498_vm4, 1e+30, %v475_v46 }
 0x5e9   : > { %v500_v13 = vsel %vm214_vm0, %v499_v0, inf }
 0x5ea   : > { %501 = vmin.xlane.f32.xlu1 %v500_v13 }
 0x677   : > { %v502_v14 = vpop.xlane.xlu1 %501 }
 0x678   : > { %vm503_vm5 = vcmp.le.f32.partialorder %v499_v0, %v502_v14 }
 0x679   : > { %v504_v15 = vsel %vm503_vm5, %v1247_v1, 64 }
 0x67a   : > { %v505_v16 = vsel %vm214_vm0, %v504_v15, 2147483647 }
 0x67b   : > { %v507_v17 = vshra.s32 %v505_v16, 16  ;;  %v506_v19 = vand.u32 65535, %v505_v16 }
 0x67d   : > { %v509_v18 = vcvt.s32.f32 %v507_v17  ;;  %v508_v21 = vcvt.s32.f32 %v506_v19 }
 0x67f   : > { %510 = vmin.xlane.f32.xlu0 %v509_v18 }
 0x70c   : > { %v511_v20 = vpop.xlane.xlu0 %510 }
 0x70d   : > { %vm512_vm6 = vcmp.eq.f32.partialorder %v509_v18, %v511_v20  ;;  %v517_v24 = vcvt.f32.s32 %v511_v20 }
 0x70e   : > { %v513_v22 = vsel %vm512_vm6, %v508_v21, inf }
 0x70f   : > { %514 = vmin.xlane.f32.xlu1 %v513_v22  ;;  %v518_v27 = vshll.u32 %v517_v24, 16 }
 0x79c   : > { %v515_v29 = vpop.xlane.xlu1 %514 }
 0x79d   : > { %v516_v10 = vcvt.f32.s32 %v515_v29 }
 0x79f   : > { %v519_v11 = vadd.s32 %v518_v27, %v516_v10 }
 0x7a1   : > { %vm522_vm8 = vcmp.eq.s32.totalorder %v1247_v1, %v519_v11  ;;  %v521_v30 = vsel %vm520_vm7, %v519_v11, %v497_v63 }
 0x7a2   : > { %v523_v31 = vsel %vm522_vm8, 1e+30, %v499_v0 }
 0x7a3   : > { %v524_v32 = vsel %vm214_vm0, %v523_v31, inf }
 0x7a4   : > { %525 = vmin.xlane.f32.xlu0 %v524_v32 }
 0x831   : > { %v526_v33 = vpop.xlane.xlu0 %525 }
 0x832   : > { %vm527_vm9 = vcmp.le.f32.partialorder %v523_v31, %v526_v33 }
 0x833   : > { %v528_v34 = vsel %vm527_vm9, %v1247_v1, 64 }
 0x834   : > { %v529_v28 = vsel %vm214_vm0, %v528_v34, 2147483647 }
 0x835   : > { %v531_v35 = vshra.s32 %v529_v28, 16  ;;  %v530_v12 = vand.u32 65535, %v529_v28 }
 0x837   : > { %v533_v36 = vcvt.s32.f32 %v531_v35  ;;  %v532_v38 = vcvt.s32.f32 %v530_v12 }
 0x839   : > { %534 = vmin.xlane.f32.xlu1 %v533_v36 }
 0x8c6   : > { %v535_v37 = vpop.xlane.xlu1 %534 }
 0x8c7   : > { %vm536_vm10 = vcmp.eq.f32.partialorder %v533_v36, %v535_v37  ;;  %v541_v45 = vcvt.f32.s32 %v535_v37 }
 0x8c8   : > { %v537_v39 = vsel %vm536_vm10, %v532_v38, inf }
 0x8c9   : > { %538 = vmin.xlane.f32.xlu0 %v537_v39  ;;  %v542_v2 = vshll.u32 %v541_v45, 16 }
 0x956   : > { %v539_v46 = vpop.xlane.xlu0 %538 }
 0x957   : > { %v540_v3 = vcvt.f32.s32 %v539_v46 }
 0x959   : > { %v543_v4 = vadd.s32 %v542_v2, %v540_v3 }
 0x95b   : > { %v545_v5 = vsel %vm544_vm11, %v543_v4, %v521_v30 }
 0x95c   : > { %553 = vperm.xlu0 %1035, %v545_v5   ;;  %547 = vperm.xlu1 %1034, %v545_v5  }
 0x960   : > { %1036 = vset.pattern.permute.xlu1 %v1167_v47  ;;  %1038 = vset.pattern.permute.xlu0 %v1168_v6 }
 0x961   : > { %559 = vperm.xlu1 %1036, %v545_v5  }
 0x965   : > { %1037 = vset.pattern.permute.xlu1 %v1168_v6 }
 0x966   : > { %565 = vperm.xlu1 %1037, %v545_v5  }
 0x9db   : > { %v554_v7 = vpop.permute.xlu0 %553  ;;  %v548_v8 = vpop.permute.xlu1 %547 }
 0x9dc   : > { %vm555_vm12 = vcmp.eq.s32.totalorder %v1247_v1, %v554_v7  ;;  %vm549_vm13 = vcmp.eq.s32.totalorder %v1247_v1, %v548_v8 }
 0x9dd   : > { %v850_v9 = vsel %vm555_vm12, 1.0, %v1164_v25  ;;  %v849_v48 = vsel %vm549_vm13, 1.0, %v1164_v25 }
 0x9de   : > { %918 = vmatprep.mubr.msk.f32.mxu1 %vm214_vm0, %v849_v48 }
 0x9df   : > { %919 = vmatmul.mubr.msk.f32.vlgmr.msra.gmra.mrb[0].mxu1 %vm214_vm0, %v850_v9 }
 0x9e0   : > { %v560_v49 = vpop.permute.xlu1 %559 }
 0x9e1   : > { %vm561_vm14 = vcmp.eq.s32.totalorder %v1247_v1, %v560_v49 }
 0x9e2   : > { %v851_v50 = vsel %vm561_vm14, 1.0, %v1164_v25 }
 0x9e3   : > { %921 = vmatprep.mubr.msk.f32.mxu1 %vm214_vm0, %v851_v50 }
 0x9e5   : > { %v566_v51 = vpop.permute.xlu1 %565 }
 0x9e6   : > { %vm567_vm15 = vcmp.eq.s32.totalorder %v1247_v1, %v566_v51 }
 0x9e7   : > { %v852_v52 = vsel %vm567_vm15, 1.0, %v1164_v25 }
 0x9e8   : > { %922 = vmatmul.mubr.msk.f32.gmra.mrb[2].mxu1 %vm214_vm0, %v852_v52 }
 0xab2   : > { %v920_v53 = vpop.f32.mrb[0].mxu1 }
 0xab3   : > { %v668_v54 = vsub.f32 %v920_v53, %v1340_v23  ;;  %v648_v55 = vpop.f32.mrb[1].mxu1 }
 0xab5   : > { %672 = vrot.lane.b32.xlu1 %v668_v54, %s1169_s26 }
 0xab6   : > { %1052 = shalt.err (!%p1049_p4)
}
 0xab7   : > { %s1053_s9 = scalar_lea.hbm %s1399_s4, 128  ;;  %s1057_s20 = scalar_lea.hbm %s1476_s3, 256 }
 0xab8   : > { %p1054_p7 = scmp.ne.s32.totalorder %s1399_s4, %s1053_s9  ;;  %p1058_p10 = scmp.lt.u32.totalorder %s1399_s4, %s1476_s3 }
 0xab9   : > { %p1059_p11 = scmp.lt.u32.totalorder %s1057_s20, %s1053_s9  ;;  %p1061_p13 = scmp.lt.u32.totalorder %s1053_s9, %s1399_s4 }
 0xaba   : > { %p1055_p8 = pnand %p1054_p7, %p1232_p5 }
 0xabb   : > { %p1060_p12 = por %p1059_p11, %p1058_p10 }
 0xabc   : > { %p1056_p9 = pneg %p1055_p8 }
 0xabd   : > { %p1062_p0 = por %p1061_p13, %p1060_p12 }
 0xabf   : > { %p1063_p1 = pnand %p1062_p0, %p1056_p9 }
 0xac1   : > { %1066 = shalt.err (!%p1063_p1)
}
 0xac2   : > { %954 = dma.vmem_to_hbm [thread:$0]  (%p1232_p5), %s723_s28, 128, %s1399_s4, %s696_s5   ;;  %v923_v1 = vpop.f32.mrb[2].mxu1  ;;  %v667_v60 = vsub.f32 %v648_v55, %v1340_v23  ;;  %vm684_vm0 = vcmask 392192   ;;  %vm686_vm1 = vcmask 588800   ;;  %vm688_vm2 = vcmask 785408  }
 0xac3   : > { %v658_v25 = vpop.f32.mrb[3].mxu1  ;;  %s1171_s29 = smov 48   ;;  %v670_v57 = vsub.f32 %v923_v1, %v1340_v23  ;;  %s1172_s30 = smov 72  }
 0xac4   : > { %v669_v56 = vsub.f32 %v658_v25, %v1340_v23  ;;  %s709_s28 = sshll.u32 %s1301_s8, 4  ;;  %s1429_s6 = scalar_lea.hbm %s1475_s2, %s859_s27  ;;  %s1431_s28 = int_to_ptr.vmem [resolvable:$true] %s709_s28 }
 0xac5   : > { %s691_s7 = scalar_lea.sflag [#allocation3], %s1243_s24  ;;  %s1067_s10 = scalar_lea.vmem %s1431_s28, 128 }
 0xac6   : > { %676 = vrot.lane.b32.xlu1 %v669_v56, %s1171_s29  ;;  %p1068_p2 = scmp.ne.s32.totalorder %s1431_s28, %s1067_s10  ;;  %s1173_s11 = smov [#allocation2]  }
 0xac7   : > { %s1071_s16 = sshll.u32 %s1173_s11, 4  ;;  %s1072_s16 = int_to_ptr.vmem [resolvable:$false] %s1071_s16 }
 0xac8   : > { %p1069_p3 = pnand %p1068_p2, %p1232_p5  ;;  %s1073_s9 = scalar_lea.vmem %s1072_s16, 256 }
 0xac9   : > { %p1074_p7 = scmp.lt.s32.totalorder %s1431_s28, %s1072_s16  ;;  %p1075_p8 = scmp.lt.s32.totalorder %s1073_s9, %s1067_s10 }
 0xaca   : > { %680 = vrot.lane.b32.xlu1 %v670_v57, %s1172_s30  ;;  %p1070_p4 = pneg %p1069_p3 }
 0xacb   : > { %p1076_p9 = por %p1075_p8, %p1074_p7 }
 0xacd   : > { %p1077_p10 = pnand %p1076_p9, %p1070_p4 }
 0xb27   : > { %v673_v58 = vpop.permute.xlu1 %672 }
 0xb28   : > { %v683_v61 = vsel %vm252_vm3, %v667_v60, %v673_v58 }
 0xb38   : > { %v677_v59 = vpop.permute.xlu1 %676 }
 0xb39   : > { %v685_v62 = vsel %vm684_vm0, %v683_v61, %v677_v59 }
 0xb3c   : > { %v681_v63 = vpop.permute.xlu1 %680 }
 0xb3d   : > { %v687_v23 = vsel %vm686_vm1, %v685_v62, %v681_v63 }
 0xb3e   : > { %689 = vst.msk [vmem:[%s1301_s8] sm:$0xff] %vm688_vm2, %v687_v23 }
 0xb3f   : > { %1080 = shalt.err (!%p1077_p10)
}
 0xb40   : > { %s1081_s24 = scalar_lea.hbm %s1429_s6, 128  ;;  %s1085_s17 = scalar_lea.hbm %s1475_s2, 256 }
 0xb41   : > { %p1082_p11 = scmp.ne.s32.totalorder %s1429_s6, %s1081_s24  ;;  %p1086_p0 = scmp.lt.u32.totalorder %s1429_s6, %s1475_s2 }
 0xb42   : > { %p1087_p1 = scmp.lt.u32.totalorder %s1085_s17, %s1081_s24  ;;  %p1089_p3 = scmp.lt.u32.totalorder %s1081_s24, %s1429_s6 }
 0xb43   : > { %p1083_p12 = pnand %p1082_p11, %p1232_p5 }
 0xb44   : > { %p1088_p2 = por %p1087_p1, %p1086_p0 }
 0xb45   : > { %p1084_p13 = pneg %p1083_p12 }
 0xb46   : > { %p1090_p4 = por %p1089_p3, %p1088_p2 }
 0xb48   : > { %p1091_p7 = pnand %p1090_p4, %p1084_p13 }
 0xb4a   : > { %1094 = shalt.err (!%p1091_p7)
}
 0xb4b   : > { %953 = dma.vmem_to_hbm [thread:$0]  (%p1232_p5), %s1431_s28, 128, %s1429_s6, %s691_s7  }
 0xb4c PF: > { %p964_p8 = scmp.ge.s32.totalorder %s1145_s15, 2  ;;  %s734_s25 = sand.u32 1, %s1133_s12  }
 0xb4d   : > { %s735_s26 = scalar_lea.sflag [#allocation3], %s734_s25 }
 0xb4e   : > { %p958_p9 = pnand %p964_p8, %p1236_p6 }
 0xb50   : > { %1124 = dma.done.wait (!%p958_p9), %s735_s26, 128  }
 0xb51   : > { %1126 = vsyncadd (!%p958_p9), %s735_s26, 4294967168  ;;  %s744_s29 = scalar_lea.sflag [#allocation5], %s734_s25 }
 0xb52   : > { %1128 = dma.done.wait (!%p958_p9), %s744_s29, 128  }
 0xb53   : > { %1130 = vsyncadd (!%p958_p9), %s744_s29, 4294967168  ;;  %p17_p5 = scmp.ge.s32.totalorder %s1219_s18, 4   ;;  %s1479_s12 = smov %s1137_s13 }
 0xb54   : > { %s1480_s13 = smov %s1141_s14  ;;  %s1481_s14 = smov %s1230_s21 }
 0xb55   : > { %s1482_s15 = smov %s1219_s18  ;;  %19 = sbr.rel (!%p17_p5) target bundleno = 5 (0x5), region = 103 }
 0xb5c   :  { %749 = vsyncpa [#allocation3], 1 }
 0xb5d   :  { %751 = vsyncpa [#allocation3 + $0x1], 1 }
 0xb5e   :  { %752 = vsyncpa [#allocation5], 1 }
 0xb5f   :  { %754 = vsyncpa [#allocation5 + $0x1], 1 }

</bundles_post_ra>
